<compile_context>
chip_gen: v5e
topology: v5e:2x2
jax: 0.10.0
libtpu: 0.0.40
codegen_flags: <defaults>
</compile_context>

<pallas_src>
import math

import jax
import jax.numpy as jnp
from jax.experimental import pallas as pl
from jax.experimental.pallas import tpu as pltpu

_HIDDEN = 32      # fc1/fc2 width from the PyTorch module
_LANE = 128       # TPU lane width: hidden feature dim padded to this
_SUBLANE = 8      # f32 sublane granularity


def _round_up(x, m):
    return (x + m - 1) // m * m


def _dense_mlp_kernel(x_ref, w1_ref, w2_ref, w3_ref, b12_ref, b3_ref, o_ref):
    """One batch tile of the 3-layer MLP (all matmuls f32-accumulated on MXU).

    Hidden dims are pre-padded to 128 lanes (lane-dense intermediates); the
    output weight / bias / store are exactly num_actions wide so the HBM
    write is narrow.  b12_ref packs b1 (row 0) and b2 (row 1) in one buffer.
    """
    x = x_ref[...]                                               # (TB, Din) f32

    h = jnp.dot(x, w1_ref[...], preferred_element_type=jnp.float32)
    h = jnp.maximum(h + b12_ref[0:1, :], 0.0)                    # (TB, 128)

    h = jnp.dot(h, w2_ref[...], preferred_element_type=jnp.float32)
    h = jnp.maximum(h + b12_ref[1:2, :], 0.0)                    # (TB, 128)

    q = jnp.dot(h, w3_ref[...], preferred_element_type=jnp.float32)
    o_ref[...] = (q + b3_ref[...]).astype(o_ref.dtype)           # (TB, A)


def pack_dense_params(params):
    """Pads/packs PyTorch-layout params into kernel-friendly buffers (once):
         w1p  : (Din, 128)       fc1 weight, columns [32:) zero
         w2p  : (128, 128)       fc2 weight in [:32, :32], zeros elsewhere
         w3p  : (128, A)         out weight in [:32, :],   zeros elsewhere
         b12p : (8, 128)         row0 = b1, row1 = b2 (zero padded)
         b3p  : (1, A)           out bias (exact width — narrow output store)
    """
    w1, b1 = params["w1"], params["b1"]
    w2, b2 = params["w2"], params["b2"]
    w3, b3 = params["w3"], params["b3"]
    din = w1.shape[0]
    na = w3.shape[1]

    assert _HIDDEN <= _LANE, "hidden width must fit in one lane group"
    assert w1.shape[1] == _HIDDEN and w2.shape == (_HIDDEN, _HIDDEN)
    assert w3.shape[0] == _HIDDEN

    w1p = jnp.zeros((din, _LANE), jnp.float32).at[:, :_HIDDEN].set(w1)
    w2p = jnp.zeros((_LANE, _LANE), jnp.float32).at[:_HIDDEN, :_HIDDEN].set(w2)
    w3p = jnp.zeros((_LANE, na), jnp.float32).at[:_HIDDEN, :].set(w3)
    b12p = jnp.zeros((_SUBLANE, _LANE), jnp.float32)
    b12p = b12p.at[0, :_HIDDEN].set(b1.reshape(-1))
    b12p = b12p.at[1, :_HIDDEN].set(b2.reshape(-1))
    b3p = b3.reshape(1, na).astype(jnp.float32)
    return {"w1p": w1p, "w2p": w2p, "w3p": w3p, "b12p": b12p, "b3p": b3p}


def dense_forward(states, packed, *, batch_tile=4096):
    """Forward pass.

    states     : (B, num_inputs) float32
    packed     : output of pack_dense_params
    batch_tile : max rows per grid step (rounded to a multiple of 8).  4096
                 keeps the double-buffered in/out tiles + lane-padded
                 intermediates around 12-16 MiB — inside the 32 MiB scoped
                 VMEM on v5e/v6e/v7x while amortizing per-step overhead.
    returns    : (B, num_actions) float32 q-values
    """
    # TODO(synk): if activations ever move to bf16 end-to-end, cast only at
    # the HBM boundary and keep f32 MXU accumulation (v5e has no bf16 VPU).
    w1p, w2p, w3p = packed["w1p"], packed["w2p"], packed["w3p"]
    b12p, b3p = packed["b12p"], packed["b3p"]
    b, din = states.shape
    na = w3p.shape[1]

    # Tile choice: biggest tile <= batch_tile, but prefer >=2 grid steps so
    # dimension_semantics=("parallel",) can shard across v7x's 2 TensorCores.
    tb = min(_round_up(batch_tile, _SUBLANE), _round_up(b, _SUBLANE))
    if b > _SUBLANE and pl.cdiv(b, tb) < 2:
        tb = _round_up(pl.cdiv(b, 2), _SUBLANE)
    grid = (pl.cdiv(b, tb),)   # ragged last block handled by Pallas masking

    flops = 2 * b * (din * _HIDDEN + _HIDDEN * _HIDDEN + _HIDDEN * na)
    bytes_accessed = 4 * (
        b * din + b * na                                  # states in, qs out
        + din * _LANE + _LANE * _LANE + _LANE * na        # padded weights
        + _SUBLANE * _LANE + na                           # biases
    )

    out = pl.pallas_call(
        _dense_mlp_kernel,
        out_shape=jax.ShapeDtypeStruct((b, na), jnp.float32),
        grid=grid,
        in_specs=[
            pl.BlockSpec((tb, din), lambda i: (i, 0)),       # states: batch-tiled
            pl.BlockSpec(w1p.shape, lambda i: (0, 0)),       # weights: VMEM-resident
            pl.BlockSpec(w2p.shape, lambda i: (0, 0)),
            pl.BlockSpec(w3p.shape, lambda i: (0, 0)),
            pl.BlockSpec(b12p.shape, lambda i: (0, 0)),      # packed b1/b2
            pl.BlockSpec(b3p.shape, lambda i: (0, 0)),       # out bias (narrow)
        ],
        out_specs=pl.BlockSpec((tb, na), lambda i: (i, 0)),  # narrow output store
        compiler_params=pltpu.CompilerParams(
            dimension_semantics=("parallel",),               # megacore on v7x
            vmem_limit_bytes=32 * 1024 * 1024,
        ),
        cost_estimate=pl.CostEstimate(
            flops=flops, transcendentals=0, bytes_accessed=bytes_accessed),
    )(states, w1p, w2p, w3p, b12p, b3p)

    return out


def init_dense_params(key, num_inputs, num_actions):
    """Init mirroring PyTorch nn.Linear's default U(-1/sqrt(fan_in), ...)."""
    def linear(k, fan_in, fan_out):
        kw, kb = jax.random.split(k)
        bound = 1.0 / math.sqrt(fan_in)
        w = jax.random.uniform(kw, (fan_in, fan_out), jnp.float32,
                               minval=-bound, maxval=bound)
        b = jax.random.uniform(kb, (1, fan_out), jnp.float32,
                               minval=-bound, maxval=bound)
        return w, b

    k1, k2, k3 = jax.random.split(key, 3)
    w1, b1 = linear(k1, num_inputs, _HIDDEN)
    w2, b2 = linear(k2, _HIDDEN, _HIDDEN)
    w3, b3 = linear(k3, _HIDDEN, num_actions)
    return {"w1": w1, "b1": b1, "w2": w2, "b2": b2, "w3": w3, "b3": b3}


def _reference_forward(states, p):
    """Pure-JAX reference of the PyTorch forward."""
    h = jnp.maximum(states @ p["w1"] + p["b1"], 0.0)
    h = jnp.maximum(h @ p["w2"] + p["b2"], 0.0)
    return h @ p["w3"] + p["b3"]


if __name__ == "__main__":
    key = jax.random.PRNGKey(0)
    k_params, k_s1, k_s2 = jax.random.split(key, 3)

    num_inputs = 8
    num_actions = 4

    params = init_dense_params(k_params, num_inputs, num_actions)
    packed = pack_dense_params(params)

    # Small case (single grid step).
    states = jax.random.normal(k_s1, (8, num_inputs), jnp.float32)
    qs = jax.block_until_ready(dense_forward(states, packed))
    ref = _reference_forward(states, params)
    assert qs.shape == (8, num_actions)
    assert jnp.allclose(qs, ref, atol=1e-5, rtol=1e-5)

    # Multi-tile case (exercises the batch grid, pipelining and the
    # ragged/masked last block: 300 rows, 128-row tiles -> 3 steps).
    states2 = jax.random.normal(k_s2, (300, num_inputs), jnp.float32)
    qs2 = jax.block_until_ready(
        dense_forward(states2, packed, batch_tile=128))
    ref2 = _reference_forward(states2, params)
    assert qs2.shape == (300, num_actions)
    assert jnp.allclose(qs2, ref2, atol=1e-5, rtol=1e-5)

    print("KERNEL_OK")
</pallas_src>

<mosaic_0001>
module attributes {stable_mosaic.version = 11 : i64} {
  func.func @_dense_mlp_kernel(%arg0: i32, %arg1: memref<8x8xf32, #tpu.memory_space<vmem>>, %arg2: memref<8x128xf32, #tpu.memory_space<vmem>>, %arg3: memref<128x128xf32, #tpu.memory_space<vmem>>, %arg4: memref<128x4xf32, #tpu.memory_space<vmem>>, %arg5: memref<8x128xf32, #tpu.memory_space<vmem>>, %arg6: memref<1x4xf32, #tpu.memory_space<vmem>>, %arg7: memref<8x4xf32, #tpu.memory_space<vmem>>) attributes {dimension_semantics = [#tpu.dimension_semantics<parallel>], iteration_bounds = array<i64: 1>, scalar_prefetch = 0 : i64, scratch_operands = 0 : i64, tpu.core_type = #tpu.core_type<tc>, window_params = [{transform_indices = @transform_0, window_bounds = array<i64: 8, 8>}, {pipeline_mode = #tpu.pipeline_mode<synchronous>, transform_indices = @transform_1, window_bounds = array<i64: 8, 128>}, {pipeline_mode = #tpu.pipeline_mode<synchronous>, transform_indices = @transform_2, window_bounds = array<i64: 128, 128>}, {pipeline_mode = #tpu.pipeline_mode<synchronous>, transform_indices = @transform_3, window_bounds = array<i64: 128, 4>}, {pipeline_mode = #tpu.pipeline_mode<synchronous>, transform_indices = @transform_4, window_bounds = array<i64: 8, 128>}, {pipeline_mode = #tpu.pipeline_mode<synchronous>, transform_indices = @transform_5, window_bounds = array<i64: 1, 4>}, {transform_indices = @transform_6, window_bounds = array<i64: 8, 4>}]} {
    %c0 = arith.constant 0 : index
    %c0_0 = arith.constant 0 : index
    %0 = vector.load %arg1[%c0, %c0_0] : memref<8x8xf32, #tpu.memory_space<vmem>>, vector<8x8xf32>
    %c0_1 = arith.constant 0 : index
    %c0_2 = arith.constant 0 : index
    %1 = vector.load %arg2[%c0_1, %c0_2] : memref<8x128xf32, #tpu.memory_space<vmem>>, vector<8x128xf32>
    %cst = arith.constant dense<0.000000e+00> : vector<8x128xf32>
    %2 = tpu.matmul %0, %1, %cst {dimension_numbers = #tpu.dot_dimension_numbers<[1], [0], [0], [1], [0, 0, 1, 1], [], []>} : vector<8x8xf32>, vector<8x128xf32>, vector<8x128xf32> -> vector<8x128xf32>
    %c0_3 = arith.constant 0 : index
    %c0_4 = arith.constant 0 : index
    %3 = vector.load %arg5[%c0_3, %c0_4] : memref<8x128xf32, #tpu.memory_space<vmem>>, vector<1x128xf32>
    %4 = vector.broadcast %3 : vector<1x128xf32> to vector<8x128xf32>
    %5 = arith.addf %2, %4 : vector<8x128xf32>
    %cst_5 = arith.constant 0.000000e+00 : f32
    %6 = vector.broadcast %cst_5 : f32 to vector<8x128xf32>
    %7 = arith.maximumf %5, %6 : vector<8x128xf32>
    %c0_6 = arith.constant 0 : index
    %c0_7 = arith.constant 0 : index
    %8 = vector.load %arg3[%c0_6, %c0_7] : memref<128x128xf32, #tpu.memory_space<vmem>>, vector<128x128xf32>
    %cst_8 = arith.constant dense<0.000000e+00> : vector<8x128xf32>
    %9 = tpu.matmul %7, %8, %cst_8 {dimension_numbers = #tpu.dot_dimension_numbers<[1], [0], [0], [1], [0, 0, 1, 1], [], []>} : vector<8x128xf32>, vector<128x128xf32>, vector<8x128xf32> -> vector<8x128xf32>
    %c1 = arith.constant 1 : index
    %c0_9 = arith.constant 0 : index
    %10 = vector.load %arg5[%c1, %c0_9] : memref<8x128xf32, #tpu.memory_space<vmem>>, vector<1x128xf32>
    %11 = vector.broadcast %10 : vector<1x128xf32> to vector<8x128xf32>
    %12 = arith.addf %9, %11 : vector<8x128xf32>
    %cst_10 = arith.constant 0.000000e+00 : f32
    %13 = vector.broadcast %cst_10 : f32 to vector<8x128xf32>
    %14 = arith.maximumf %12, %13 : vector<8x128xf32>
    %c0_11 = arith.constant 0 : index
    %c0_12 = arith.constant 0 : index
    %15 = vector.load %arg4[%c0_11, %c0_12] : memref<128x4xf32, #tpu.memory_space<vmem>>, vector<128x4xf32>
    %cst_13 = arith.constant dense<0.000000e+00> : vector<8x4xf32>
    %16 = tpu.matmul %14, %15, %cst_13 {dimension_numbers = #tpu.dot_dimension_numbers<[1], [0], [0], [1], [0, 0, 1, 1], [], []>} : vector<8x128xf32>, vector<128x4xf32>, vector<8x4xf32> -> vector<8x4xf32>
    %c0_14 = arith.constant 0 : index
    %c0_15 = arith.constant 0 : index
    %17 = vector.load %arg6[%c0_14, %c0_15] : memref<1x4xf32, #tpu.memory_space<vmem>>, vector<1x4xf32>
    %18 = vector.broadcast %17 : vector<1x4xf32> to vector<8x4xf32>
    %19 = arith.addf %16, %18 : vector<8x4xf32>
    %c0_16 = arith.constant 0 : index
    %c0_17 = arith.constant 0 : index
    %20 = vector.load %arg7[%c0_16, %c0_17] : memref<8x4xf32, #tpu.memory_space<vmem>>, vector<8x4xf32>
    tpu.vector_store %arg7[%c0_16, %c0_17], %19 {strides = array<i32>} : memref<8x4xf32, #tpu.memory_space<vmem>>, vector<8x4xf32>,
    return
  }
  func.func @transform_0(%arg0: i32) -> (i32, i32) {
    %c0_i32 = arith.constant 0 : i32
    %c0_i32_0 = arith.constant 0 : i32
    return %arg0, %c0_i32 : i32, i32
  }
  func.func @transform_1(%arg0: i32) -> (i32, i32) {
    %c0_i32 = arith.constant 0 : i32
    %c0_i32_0 = arith.constant 0 : i32
    %c0_i32_1 = arith.constant 0 : i32
    return %c0_i32, %c0_i32_0 : i32, i32
  }
  func.func @transform_2(%arg0: i32) -> (i32, i32) {
    %c0_i32 = arith.constant 0 : i32
    %c0_i32_0 = arith.constant 0 : i32
    %c0_i32_1 = arith.constant 0 : i32
    return %c0_i32, %c0_i32_0 : i32, i32
  }
  func.func @transform_3(%arg0: i32) -> (i32, i32) {
    %c0_i32 = arith.constant 0 : i32
    %c0_i32_0 = arith.constant 0 : i32
    %c0_i32_1 = arith.constant 0 : i32
    return %c0_i32, %c0_i32_0 : i32, i32
  }
  func.func @transform_4(%arg0: i32) -> (i32, i32) {
    %c0_i32 = arith.constant 0 : i32
    %c0_i32_0 = arith.constant 0 : i32
    %c0_i32_1 = arith.constant 0 : i32
    return %c0_i32, %c0_i32_0 : i32, i32
  }
  func.func @transform_5(%arg0: i32) -> (i32, i32) {
    %c0_i32 = arith.constant 0 : i32
    %c0_i32_0 = arith.constant 0 : i32
    %c0_i32_1 = arith.constant 0 : i32
    return %c0_i32, %c0_i32_0 : i32, i32
  }
  func.func @transform_6(%arg0: i32) -> (i32, i32) {
    %c0_i32 = arith.constant 0 : i32
    %c0_i32_0 = arith.constant 0 : i32
    return %arg0, %c0_i32 : i32, i32
  }
}

</mosaic_0001>

<bundles_post_ra>
// kernel: tpu_custom_call.1
= control target key start
LH: loop header
LB: loop body
LE: loop exit
PB: predicated region body
PF: predicated region fallthrough
CT: control target
= control target key end

     0   :  { %11 = vsyncpa [#allocation3], 0  ;;  %s412_s0 = inlined_call_operand.hbm [shape: f32[8,8], index: 0, kind: input, shape index: {}]   ;;  %s413_s1 = inlined_call_operand.hbm [shape: f32[8,128], index: 1, kind: input, shape index: {}]   ;;  %s414_s2 = inlined_call_operand.vmem [shape: f32[128,128], index: 2, kind: input, shape index: {}]   ;;  %s415_s3 = inlined_call_operand.vmem [shape: f32[128,4], index: 3, kind: input, shape index: {}]   ;;  %s416_s4 = inlined_call_operand.hbm [shape: f32[8,128], index: 4, kind: input, shape index: {}]   ;;  %s417_s5 = inlined_call_operand.vmem [shape: f32[1,4], index: 5, kind: input, shape index: {}]   ;;  %s418_s6 = inlined_call_operand.vmem [shape: f32[8,4], index: 6, kind: output, shape index: {}]  }
   0x1   :  { %12 = vsyncpa [#allocation5], 0  ;;  %s29_s23 = sshll.u32 %s413_s1, 4  ;;  %s263_s24 = smov [#allocation4]   ;;  %s30_s23 = int_to_ptr.hbm [resolvable:$true] %s29_s23 }
   0x2   :  { %s31_s25 = sshll.u32 %s263_s24, 4  ;;  %s18_s28 = sshll.u32 %s412_s0, 4  ;;  %s32_s25 = int_to_ptr.vmem [resolvable:$true] %s31_s25  ;;  %s19_s28 = int_to_ptr.hbm [resolvable:$true] %s18_s28 }
   0x3   :  { %34 = dma.hbm_to_vmem [thread:$0]  %s30_s23, 128, %s32_s25, [#allocation5]  }
   0x4   :  { %s264_s29 = smov [#allocation2]   ;;  %s44_s9 = sshll.u32 %s416_s4, 4  ;;  %s45_s9 = int_to_ptr.hbm [resolvable:$true] %s44_s9 }
   0x5   :  { %s20_s30 = sshll.u32 %s264_s29, 4  ;;  %s265_s1 = smov [#allocation6]   ;;  %s21_s30 = int_to_ptr.vmem [resolvable:$true] %s20_s30 }
   0x6   :  { %23 = dma.hbm_to_vmem [thread:$0]  %s19_s28, 128, %s21_s30, [#allocation3]  }
   0x7   :  { %s46_s10 = sshll.u32 %s265_s1, 4  ;;  %s47_s10 = int_to_ptr.vmem [resolvable:$true] %s46_s10 }
   0x8   :  { %49 = dma.hbm_to_vmem [thread:$0]  %s45_s9, 128, %s47_s10, [#allocation5]  }
   0x9   :  { %259 = dma.done.wait [#allocation3], 128  }
   0xa   :  { %260 = vsyncadd [#allocation3], 4294967168 }
   0xb   :  { %261 = dma.done.wait [#allocation5], 256  }
   0xc   :  { %262 = vsyncadd [#allocation5], 4294967040  ;;  %vm68_vm0 = vcmask 64512   ;;  %v65_v0 = vld [vmem:[#allocation4] sm:$0xff]  ;;  %v64_v1 = vld [vmem:[#allocation2] sm:$0xff]  ;;  %vm172_vm1 = vcmask 31744  }
   0xd   :  { %v108_v2 = vld [vmem:[%s414_s2 + $0x78] sm:$0xff]  ;;  %87 = vmatpush.msra.mxu0 %v65_v0  ;;  %v107_v3 = vld [vmem:[%s414_s2 + $0x70] sm:$0xff]  ;;  %v106_v4 = vld [vmem:[%s414_s2 + $0x68] sm:$0xff] }
   0xe   :  { %111 = vmatpush.msra.mxu1 %v108_v2  ;;  %180 = vmatmul.msk.f32.vlgmr.msra.gmra.mxu0 %vm68_vm0, %v64_v1  ;;  %v105_v5 = vld [vmem:[%s414_s2 + $0x60] sm:$0xff]  ;;  %v104_v6 = vld [vmem:[%s414_s2 + $0x58] sm:$0xff]  ;;  %v103_v7 = vld [vmem:[%s414_s2 + $0x50] sm:$0xff] }
   0xf   :  { %v102_v8 = vld [vmem:[%s414_s2 + $0x48] sm:$0xff]  ;;  %v101_v9 = vld [vmem:[%s414_s2 + $0x40] sm:$0xff]  ;;  %v100_v10 = vld [vmem:[%s414_s2 + $0x38] sm:$0xff] }
  0x10   :  { %112 = vmatpush.msra.mxu1 %v107_v3  ;;  %v99_v11 = vld [vmem:[%s414_s2 + $0x30] sm:$0xff]  ;;  %v98_v12 = vld [vmem:[%s414_s2 + $0x28] sm:$0xff]  ;;  %v97_v13 = vld [vmem:[%s414_s2 + $0x20] sm:$0xff] }
  0x11   :  { %v96_v14 = vld [vmem:[%s414_s2 + $0x18] sm:$0xff]  ;;  %v95_v15 = vld [vmem:[%s414_s2 + $0x10] sm:$0xff]  ;;  %v94_v16 = vld [vmem:[%s414_s2 + $0x8] sm:$0xff] }
  0x12   :  { %113 = vmatpush.msra.mxu1 %v106_v4  ;;  %v93_v17 = vld [vmem:[%s414_s2] sm:$0xff]  ;;  %v147_v18 = vld [vmem:[%s415_s3 + $0x78] sm:$0xff]  ;;  %v146_v19 = vld [vmem:[%s415_s3 + $0x70] sm:$0xff] }
  0x13   :  { %152 = vmatpush.msra.mxu2 %v147_v18  ;;  %v145_v20 = vld [vmem:[%s415_s3 + $0x68] sm:$0xff]  ;;  %v144_v21 = vld [vmem:[%s415_s3 + $0x60] sm:$0xff]  ;;  %v143_v22 = vld [vmem:[%s415_s3 + $0x58] sm:$0xff] }
  0x14   :  { %114 = vmatpush.msra.mxu1 %v105_v5  ;;  %v142_v23 = vld [vmem:[%s415_s3 + $0x50] sm:$0xff]  ;;  %v141_v24 = vld [vmem:[%s415_s3 + $0x48] sm:$0xff]  ;;  %v140_v25 = vld [vmem:[%s415_s3 + $0x40] sm:$0xff] }
  0x15   :  { %153 = vmatpush.msra.mxu2 %v146_v19  ;;  %v139_v26 = vld [vmem:[%s415_s3 + $0x38] sm:$0xff]  ;;  %v138_v27 = vld [vmem:[%s415_s3 + $0x30] sm:$0xff]  ;;  %v137_v28 = vld [vmem:[%s415_s3 + $0x28] sm:$0xff] }
  0x16   :  { %115 = vmatpush.msra.mxu1 %v104_v6  ;;  %v136_v29 = vld [vmem:[%s415_s3 + $0x20] sm:$0xff]  ;;  %v135_v30 = vld [vmem:[%s415_s3 + $0x18] sm:$0xff]  ;;  %v184_v31 = vld [vmem:[#allocation6] ss:$0 sm:$0xff] }
  0x17   :  { %154 = vmatpush.msra.mxu2 %v145_v20  ;;  %v134_v35 = vld [vmem:[%s415_s3 + $0x10] sm:$0xff]  ;;  %v133_v36 = vld [vmem:[%s415_s3 + $0x8] sm:$0xff]  ;;  %v132_v37 = vld [vmem:[%s415_s3] sm:$0xff] }
  0x18   :  { %116 = vmatpush.msra.mxu1 %v103_v7  ;;  %v185_v38 = vld [vmem:[#allocation6 + $0x1] ss:$0 sm:$0xff]  ;;  %v186_v42 = vld [vmem:[%s417_s5] ss:$0 sm:$0xff] }
  0x19   :  { %155 = vmatpush.msra.mxu2 %v144_v21 }
  0x1a   :  { %117 = vmatpush.msra.mxu1 %v102_v8 }
  0x1b   :  { %156 = vmatpush.msra.mxu2 %v143_v22 }
  0x1c   :  { %118 = vmatpush.msra.mxu1 %v101_v9 }
  0x1d   :  { %157 = vmatpush.msra.mxu2 %v142_v23 }
  0x1e   :  { %119 = vmatpush.msra.mxu1 %v100_v10 }
  0x1f   :  { %158 = vmatpush.msra.mxu2 %v141_v24 }
  0x20   :  { %120 = vmatpush.msra.mxu1 %v99_v11 }
  0x21   :  { %159 = vmatpush.msra.mxu2 %v140_v25 }
  0x22   :  { %121 = vmatpush.msra.mxu1 %v98_v12 }
  0x23   :  { %160 = vmatpush.msra.mxu2 %v139_v26 }
  0x24   :  { %122 = vmatpush.msra.mxu1 %v97_v13 }
  0x25   :  { %161 = vmatpush.msra.mxu2 %v138_v27 }
  0x26   :  { %123 = vmatpush.msra.mxu1 %v96_v14 }
  0x27   :  { %162 = vmatpush.msra.mxu2 %v137_v28 }
  0x28   :  { %124 = vmatpush.msra.mxu1 %v95_v15 }
  0x29   :  { %163 = vmatpush.msra.mxu2 %v136_v29 }
  0x2a   :  { %125 = vmatpush.msra.mxu1 %v94_v16 }
  0x2b   :  { %164 = vmatpush.msra.mxu2 %v135_v30 }
  0x2c   :  { %126 = vmatpush.msra.mxu1 %v93_v17 }
  0x2d   :  { %165 = vmatpush.msra.mxu2 %v134_v35 }
  0x2f   :  { %166 = vmatpush.msra.mxu2 %v133_v36 }
  0x31   :  { %167 = vmatpush.msra.mxu2 %v132_v37 }
  0x8b   :  { %v89_v32 = vpop.f32.mrf.mxu0 }
  0x8c   :  { %v90_v33 = vadd.f32 %v184_v31, %v89_v32 }
  0x8e   :  { %v92_v34 = vmax.f32 %v90_v33, 0.0 }
  0x90   :  { %127 = vmatmul.f32.vlgmr.msra.gmra.mxu1 %v92_v34 }
 0x10d   :  { %v128_v39 = vpop.f32.mrf.mxu1 }
 0x10e   :  { %v129_v40 = vadd.f32 %v185_v38, %v128_v39 }
 0x110   :  { %v131_v41 = vmax.f32 %v129_v40, 0.0 }
 0x112   :  { %168 = vmatmul.f32.vlgmr.msra.gmra.mxu2 %v131_v41 }
 0x195   :  { %v169_v43 = vpop.f32.mrf.mxu2 }
 0x196   :  { %v170_v44 = vadd.f32 %v186_v42, %v169_v43 }
 0x198   :  { %173 = vst.msk [vmem:[%s418_s6] sm:$0xff] %vm172_vm1, %v170_v44 }
 0x199   :  { %178 = vsyncpa [#allocation3], 1 }
 0x19a   :  { %179 = vsyncpa [#allocation5], 1 }

</bundles_post_ra>
